<compile_context>
chip_gen: v6e
topology: v6e:2x2x1
jax: 0.10.0
libtpu: 0.0.40
codegen_flags: <defaults>
</compile_context>

<pallas_src>
import math
from functools import partial

import jax
import jax.numpy as jnp
from jax.experimental import pallas as pl
from jax.experimental.pallas import tpu as pltpu

_COEF = math.sqrt(math.pi / 2.0)   # NOTE: module uses sqrt(pi/2), not sqrt(2/pi)
_CUBIC = 0.044715

_LANES = 128
_TARGET_TILE_BYTES = 2 * 1024 * 1024   # ~2 MiB per buffer (safe on v7x 64 MiB VMEM)
_MIN_TILE_BYTES = 256 * 1024           # don't shrink blocks below ~256 KiB


def _gelu_kernel(x_ref, o_ref):
    # Compute in f32 regardless of storage dtype (free on a mem-bound kernel).
    x = x_ref[...].astype(jnp.float32)
    # x + c*x^3 == x * (1 + c*x^2): one fewer VPU multiply.
    inner = _COEF * x * (1.0 + _CUBIC * x * x)
    y = 0.5 * x * (1.0 + jnp.tanh(inner))
    o_ref[...] = y.astype(o_ref.dtype)


def _round_up(n: int, m: int) -> int:
    return pl.cdiv(n, m) * m


def _choose_block_rows(rows: int, itemsize: int) -> int:
    """Pick a lane-dense block height (sublane-aligned)."""
    # Sublane alignment: 8 for 32-bit, 16 for 16-bit, 32 for 8-bit dtypes.
    sub = max(8, 32 // max(1, itemsize))
    target_rows = max(sub, (_TARGET_TILE_BYTES // (_LANES * itemsize)) // sub * sub)

    if rows <= target_rows:
        # Small/medium tensor: one block, one grid step. No tile halving on
        # single-TC chips (v5e/v6e); the partial block is masked by Pallas.
        return _round_up(rows, sub)

    # Large tensor: aim for >= 8 grid steps so each TC gets a double-buffered
    # pipeline (and v7x's two TCs each see >= 4 steps), but keep each block
    # >= ~256 KiB so DMAs stay efficient and per-step overhead is amortized.
    min_rows = max(sub, (_MIN_TILE_BYTES // (_LANES * itemsize)) // sub * sub)
    eighth = _round_up(pl.cdiv(rows, 8), sub)
    return max(min_rows, min(target_rows, eighth))


@jax.jit
def gelu_pallas(x: jax.Array) -> jax.Array:
    """Apply the module's GeLU elementwise. Accepts any shape / float dtype."""
    orig_shape = x.shape
    orig_dtype = x.dtype
    itemsize = jnp.dtype(orig_dtype).itemsize
    total = x.size
    if total == 0:
        return x

    lane_rem = total % _LANES
    if lane_rem == 0:
        # Free metadata reshape of a contiguous array: zero-copy path.
        x2d = x.reshape(-1, _LANES)
    else:
        # Rare tail case (<128 leftover elements): pad only up to the next
        # lane boundary. gelu(0) == 0, padding is sliced off below.
        x2d = jnp.pad(x.reshape(-1), (0, _LANES - lane_rem)).reshape(-1, _LANES)

    rows = x2d.shape[0]
    br = _choose_block_rows(rows, itemsize)
    grid = (pl.cdiv(rows, br),)   # partial last block is masked by Pallas

    # 2x in + 2x out double-buffered I/O tiles plus f32 intermediates.
    tile_io = br * _LANES * itemsize
    tile_f32 = br * _LANES * 4
    vmem_limit = min(max(4 * tile_io + 6 * tile_f32, 16 * 1024 * 1024),
                     48 * 1024 * 1024)

    out2d = pl.pallas_call(
        _gelu_kernel,
        out_shape=jax.ShapeDtypeStruct((rows, _LANES), orig_dtype),
        grid_spec=pltpu.PrefetchScalarGridSpec(
            num_scalar_prefetch=0,
            grid=grid,
            in_specs=[pl.BlockSpec((br, _LANES), lambda i: (i, 0))],
            out_specs=pl.BlockSpec((br, _LANES), lambda i: (i, 0)),
        ),
        compiler_params=pltpu.CompilerParams(
            dimension_semantics=("parallel",),
            vmem_limit_bytes=vmem_limit,
        ),
    )(x2d)

    if lane_rem == 0:
        return out2d.reshape(orig_shape)
    return out2d.reshape(-1)[:total].reshape(orig_shape)


def _gelu_ref(x):
    xf = x.astype(jnp.float32)
    y = 0.5 * xf * (1.0 + jnp.tanh(_COEF * (xf + _CUBIC * xf ** 3)))
    return y.astype(x.dtype)


if __name__ == "__main__":
    key = jax.random.PRNGKey(0)
    k0, k1, k2 = jax.random.split(key, 3)

    # 1) Small NCHW-style input consistent with a conv/MNIST-like activation.
    x = jax.random.normal(k0, (2, 4, 16, 16), dtype=jnp.float32)
    out = jax.block_until_ready(gelu_pallas(x))
    assert out.shape == x.shape and out.dtype == x.dtype
    assert jnp.max(jnp.abs(out - _gelu_ref(x))) < 1e-5

    # 2) Flat size a multiple of 128 but rows not a multiple of the sublane
    #    block -> exercises Pallas partial-block masking (zero-copy path).
    x_odd = jax.random.normal(k1, (4, 16, 72), dtype=jnp.float32)
    out_odd = jax.block_until_ready(gelu_pallas(x_odd))
    assert jnp.max(jnp.abs(out_odd - _gelu_ref(x_odd))) < 1e-5

    # 3) bfloat16 input with a <128-element lane tail -> pad-tail path and
    #    f32 internal compute.
    x_bf16 = jax.random.normal(k2, (3, 5, 7, 13), dtype=jnp.bfloat16)
    out_bf16 = jax.block_until_ready(gelu_pallas(x_bf16))
    ref_bf16 = _gelu_ref(x_bf16)
    assert out_bf16.shape == x_bf16.shape and out_bf16.dtype == x_bf16.dtype
    assert jnp.max(jnp.abs(out_bf16.astype(jnp.float32)
                           - ref_bf16.astype(jnp.float32))) < 2e-2

    print("KERNEL_OK")
</pallas_src>

<mosaic_0001>
module attributes {stable_mosaic.version = 11 : i64} {
  func.func @_gelu_kernel(%arg0: i32, %arg1: memref<16x128xf32, #tpu.memory_space<vmem>>, %arg2: memref<16x128xf32, #tpu.memory_space<vmem>>) attributes {dimension_semantics = [#tpu.dimension_semantics<parallel>], iteration_bounds = array<i64: 1>, scalar_prefetch = 0 : i64, scratch_operands = 0 : i64, tpu.core_type = #tpu.core_type<tc>, window_params = [{transform_indices = @transform_0, window_bounds = array<i64: 16, 128>}, {transform_indices = @transform_1, window_bounds = array<i64: 16, 128>}]} {
    %c0 = arith.constant 0 : index
    %c0_0 = arith.constant 0 : index
    %0 = vector.load %arg1[%c0, %c0_0] : memref<16x128xf32, #tpu.memory_space<vmem>>, vector<16x128xf32>
    %cst = arith.constant 1.25331414 : f32
    %1 = vector.broadcast %cst : f32 to vector<16x128xf32>
    %2 = arith.mulf %1, %0 : vector<16x128xf32>
    %cst_1 = arith.constant 4.471500e-02 : f32
    %3 = vector.broadcast %cst_1 : f32 to vector<16x128xf32>
    %4 = arith.mulf %3, %0 : vector<16x128xf32>
    %5 = arith.mulf %4, %0 : vector<16x128xf32>
    %cst_2 = arith.constant 1.000000e+00 : f32
    %6 = vector.broadcast %cst_2 : f32 to vector<16x128xf32>
    %7 = arith.addf %6, %5 : vector<16x128xf32>
    %8 = arith.mulf %2, %7 : vector<16x128xf32>
    %cst_3 = arith.constant 5.000000e-01 : f32
    %9 = vector.broadcast %cst_3 : f32 to vector<16x128xf32>
    %10 = arith.mulf %9, %0 : vector<16x128xf32>
    %11 = math.tanh %8 : vector<16x128xf32>
    %cst_4 = arith.constant 1.000000e+00 : f32
    %12 = vector.broadcast %cst_4 : f32 to vector<16x128xf32>
    %13 = arith.addf %12, %11 : vector<16x128xf32>
    %14 = arith.mulf %10, %13 : vector<16x128xf32>
    %c0_5 = arith.constant 0 : index
    %c0_6 = arith.constant 0 : index
    %15 = vector.load %arg2[%c0_5, %c0_6] : memref<16x128xf32, #tpu.memory_space<vmem>>, vector<16x128xf32>
    tpu.vector_store %arg2[%c0_5, %c0_6], %14 {strides = array<i32>} : memref<16x128xf32, #tpu.memory_space<vmem>>, vector<16x128xf32>,
    return
  }
  func.func @transform_0(%arg0: i32) -> (i32, i32) {
    %c0_i32 = arith.constant 0 : i32
    %c0_i32_0 = arith.constant 0 : i32
    return %arg0, %c0_i32 : i32, i32
  }
  func.func @transform_1(%arg0: i32) -> (i32, i32) {
    %c0_i32 = arith.constant 0 : i32
    %c0_i32_0 = arith.constant 0 : i32
    return %arg0, %c0_i32 : i32, i32
  }
}

</mosaic_0001>

<bundles_post_ra>
// kernel: gelu_pallas.1
= control target key start
LH: loop header
LB: loop body
LE: loop exit
PB: predicated region body
PF: predicated region fallthrough
CT: control target
= control target key end

     0   :  { %s60_s0 = inlined_call_operand.vmem [shape: f32[16,128], index: 0, kind: input, shape index: {}]   ;;  %s61_s1 = inlined_call_operand.vmem [shape: f32[16,128], index: 1, kind: output, shape index: {}]  }
   0x1   :  { %v8_v0 = vld [vmem:[%s60_s0] sm:$0xff]  ;;  %v9_v1 = vld [vmem:[%s60_s0 + $0x8] sm:$0xff] }
   0x2   :  { %v12_v2 = vmul.f32 0.044715, %v8_v0  ;;  %v13_v3 = vmul.f32 0.044715, %v9_v1  ;;  %v10_v4 = vmul.f32 1.2533141, %v8_v0 }
   0x3   :  { %v11_v6 = vmul.f32 1.2533141, %v9_v1  ;;  %v20_v12 = vmul.f32 0.5, %v8_v0  ;;  %v21_v14 = vmul.f32 0.5, %v9_v1 }
   0x4   :  { %v14_v5 = vmul.f32 %v12_v2, %v8_v0  ;;  %v15_v7 = vmul.f32 %v13_v3, %v9_v1 }
   0x6   :  { %v16_v8 = vadd.f32 1.0, %v14_v5  ;;  %v17_v9 = vadd.f32 1.0, %v15_v7 }
   0x8   :  { %v18_v10 = vmul.f32 %v16_v8, %v10_v4  ;;  %v19_v11 = vmul.f32 %v17_v9, %v11_v6 }
   0xa   :  { %34 = vtanh.f32 %v18_v10 }
   0xb   :  { %36 = vtanh.f32 %v19_v11 }
  0x17   :  { %v35_v13 = vpop.eup %34 }
  0x18   :  { %v37_v15 = vpop.eup %36  ;;  %v24_v16 = vadd.f32 1.0, %v35_v13 }
  0x19   :  { %v25_v17 = vadd.f32 1.0, %v37_v15 }
  0x1a   :  { %v26_v18 = vmul.f32 %v24_v16, %v20_v12 }
  0x1b   :  { %v27_v19 = vmul.f32 %v25_v17, %v21_v14 }
  0x1c   :  { %28 = vst [vmem:[%s61_s1] sm:$0xff] %v26_v18 }
  0x1d   :  { %29 = vst [vmem:[%s61_s1 + $0x8] sm:$0xff] %v27_v19 }

</bundles_post_ra>
